<compile_context>
chip_gen: v7x
topology: tpu7x:2x2x1
jax: 0.10.0
libtpu: 0.0.40
codegen_flags: <defaults>
</compile_context>

<pallas_src>
import jax
import jax.numpy as jnp
from jax.experimental import pallas as pl
from jax.experimental.pallas import tpu as pltpu

INPUT_SIZE = 2
HIDDEN_SIZE = 4
OUTPUT_SIZE = 2

LANE = 128   # lane width: pad all feature dims to this
TB = 8       # batch tile (sublane-aligned)


def mlp_kernel(x_ref, w1_ref, b1_ref, w2_ref, b2_ref, o_ref):
    # x_ref: (TB, LANE)  w1_ref: (LANE, LANE)  b1_ref: (1, LANE)
    # w2_ref: (LANE, LANE)  b2_ref: (1, LANE)  o_ref: (TB, LANE)
    x = x_ref[...]
    h = jnp.dot(x, w1_ref[...], preferred_element_type=jnp.float32) + b1_ref[...]
    h = jax.nn.sigmoid(h)                       # EUP exp/recip, VALU-free
    y = jnp.dot(h, w2_ref[...], preferred_element_type=jnp.float32) + b2_ref[...]
    o_ref[...] = y.astype(o_ref.dtype)


def _pad2d(a, rows, cols):
    return jnp.pad(a, ((0, rows - a.shape[0]), (0, cols - a.shape[1])))


def mlp_forward(x, w1, b1, w2, b2):
    """x: (B, INPUT_SIZE) f32; w1: (in, hidden); b1: (1, hidden);
    w2: (hidden, out); b2: (1, out). Returns (B, OUTPUT_SIZE) f32."""
    B = x.shape[0]
    Bp = pl.cdiv(B, TB) * TB

    # Zero-pad to lane/sublane-aligned shapes (semantics preserved; see header).
    xp = _pad2d(x.astype(jnp.float32), Bp, LANE)          # (Bp, 128)
    w1p = _pad2d(w1.astype(jnp.float32), LANE, LANE)      # (128, 128)
    b1p = _pad2d(b1.astype(jnp.float32), 1, LANE)         # (1, 128)
    w2p = _pad2d(w2.astype(jnp.float32), LANE, LANE)      # (128, 128)
    b2p = _pad2d(b2.astype(jnp.float32), 1, LANE)         # (1, 128)

    cost = pl.CostEstimate(
        flops=2 * Bp * LANE * LANE * 2,                    # two matmuls
        transcendentals=Bp * LANE,                         # sigmoid exps
        bytes_accessed=4 * (2 * Bp * LANE + 2 * LANE * LANE + 2 * LANE),
    )

    out_p = pl.pallas_call(
        mlp_kernel,
        out_shape=jax.ShapeDtypeStruct((Bp, LANE), jnp.float32),
        grid=(Bp // TB,),
        in_specs=[
            pl.BlockSpec((TB, LANE), lambda i: (i, 0)),      # x: batch-tiled
            pl.BlockSpec((LANE, LANE), lambda i: (0, 0)),    # w1: resident
            pl.BlockSpec((1, LANE), lambda i: (0, 0)),       # b1: lane-dense row
            pl.BlockSpec((LANE, LANE), lambda i: (0, 0)),    # w2: resident
            pl.BlockSpec((1, LANE), lambda i: (0, 0)),       # b2: lane-dense row
        ],
        out_specs=pl.BlockSpec((TB, LANE), lambda i: (i, 0)),
        compiler_params=pltpu.CompilerParams(
            dimension_semantics=("parallel",),
        ),
        cost_estimate=cost,
    )(xp, w1p, b1p, w2p, b2p)

    # Slice back to the logical shape.
    return out_p[:B, :OUTPUT_SIZE]


def init_params(key):
    """Deterministic init mimicking nn.Linear (uniform +/- 1/sqrt(fan_in)).
    Weights stored pre-transposed as (in, out) so the kernel computes x @ W + b."""
    k1, k2, k3, k4 = jax.random.split(key, 4)
    bound1 = 1.0 / jnp.sqrt(INPUT_SIZE)
    bound2 = 1.0 / jnp.sqrt(HIDDEN_SIZE)
    w1 = jax.random.uniform(k1, (INPUT_SIZE, HIDDEN_SIZE),
                            minval=-bound1, maxval=bound1, dtype=jnp.float32)
    b1 = jax.random.uniform(k2, (1, HIDDEN_SIZE),
                            minval=-bound1, maxval=bound1, dtype=jnp.float32)
    w2 = jax.random.uniform(k3, (HIDDEN_SIZE, OUTPUT_SIZE),
                            minval=-bound2, maxval=bound2, dtype=jnp.float32)
    b2 = jax.random.uniform(k4, (1, OUTPUT_SIZE),
                            minval=-bound2, maxval=bound2, dtype=jnp.float32)
    return w1, b1, w2, b2


def mlp_reference(x, w1, b1, w2, b2):
    h = jax.nn.sigmoid(x @ w1 + b1)
    return h @ w2 + b2


if __name__ == "__main__":
    key = jax.random.PRNGKey(0)
    pkey, xkey = jax.random.split(key)
    w1, b1, w2, b2 = init_params(pkey)

    # batch=2 inputs; first row matches the original script's x = [1.0, 2.0]
    x = jnp.concatenate(
        [jnp.array([[1.0, 2.0]], dtype=jnp.float32),
         jax.random.normal(xkey, (1, INPUT_SIZE), dtype=jnp.float32)],
        axis=0,
    )

    out = jax.block_until_ready(mlp_forward(x, w1, b1, w2, b2))
    ref = mlp_reference(x, w1, b1, w2, b2)

    assert out.shape == (2, OUTPUT_SIZE)
    assert jnp.allclose(out, ref, atol=1e-5, rtol=1e-5)

    print("KERNEL_OK")
</pallas_src>

<mosaic_0001>
module attributes {stable_mosaic.version = 11 : i64} {
  func.func @mlp_kernel(%arg0: i32, %arg1: memref<8x128xf32, #tpu.memory_space<vmem>>, %arg2: memref<128x128xf32, #tpu.memory_space<vmem>>, %arg3: memref<1x128xf32, #tpu.memory_space<vmem>>, %arg4: memref<128x128xf32, #tpu.memory_space<vmem>>, %arg5: memref<1x128xf32, #tpu.memory_space<vmem>>, %arg6: memref<8x128xf32, #tpu.memory_space<vmem>>) attributes {dimension_semantics = [#tpu.dimension_semantics<parallel>], iteration_bounds = array<i64: 1>, scalar_prefetch = 0 : i64, scratch_operands = 0 : i64, tpu.core_type = #tpu.core_type<tc>, window_params = [{transform_indices = @transform_0, window_bounds = array<i64: 8, 128>}, {pipeline_mode = #tpu.pipeline_mode<synchronous>, transform_indices = @transform_1, window_bounds = array<i64: 128, 128>}, {pipeline_mode = #tpu.pipeline_mode<synchronous>, transform_indices = @transform_2, window_bounds = array<i64: 1, 128>}, {pipeline_mode = #tpu.pipeline_mode<synchronous>, transform_indices = @transform_3, window_bounds = array<i64: 128, 128>}, {pipeline_mode = #tpu.pipeline_mode<synchronous>, transform_indices = @transform_4, window_bounds = array<i64: 1, 128>}, {transform_indices = @transform_5, window_bounds = array<i64: 8, 128>}]} {
    %c0 = arith.constant 0 : index
    %c0_0 = arith.constant 0 : index
    %0 = vector.load %arg1[%c0, %c0_0] : memref<8x128xf32, #tpu.memory_space<vmem>>, vector<8x128xf32>
    %c0_1 = arith.constant 0 : index
    %c0_2 = arith.constant 0 : index
    %1 = vector.load %arg2[%c0_1, %c0_2] : memref<128x128xf32, #tpu.memory_space<vmem>>, vector<128x128xf32>
    %cst = arith.constant dense<0.000000e+00> : vector<8x128xf32>
    %2 = tpu.matmul %0, %1, %cst {dimension_numbers = #tpu.dot_dimension_numbers<[1], [0], [0], [1], [0, 0, 1, 1], [], []>} : vector<8x128xf32>, vector<128x128xf32>, vector<8x128xf32> -> vector<8x128xf32>
    %c0_3 = arith.constant 0 : index
    %c0_4 = arith.constant 0 : index
    %3 = vector.load %arg3[%c0_3, %c0_4] : memref<1x128xf32, #tpu.memory_space<vmem>>, vector<1x128xf32>
    %4 = vector.broadcast %3 : vector<1x128xf32> to vector<8x128xf32>
    %5 = arith.addf %2, %4 : vector<8x128xf32>
    %6 = arith.negf %5 : vector<8x128xf32>
    %7 = math.exp %6 : vector<8x128xf32>
    %cst_5 = arith.constant 1.000000e+00 : f32
    %8 = vector.broadcast %cst_5 : f32 to vector<8x128xf32>
    %9 = arith.addf %8, %7 : vector<8x128xf32>
    %10 = arith.divf %8, %9 : vector<8x128xf32>
    %c0_6 = arith.constant 0 : index
    %c0_7 = arith.constant 0 : index
    %11 = vector.load %arg4[%c0_6, %c0_7] : memref<128x128xf32, #tpu.memory_space<vmem>>, vector<128x128xf32>
    %cst_8 = arith.constant dense<0.000000e+00> : vector<8x128xf32>
    %12 = tpu.matmul %10, %11, %cst_8 {dimension_numbers = #tpu.dot_dimension_numbers<[1], [0], [0], [1], [0, 0, 1, 1], [], []>} : vector<8x128xf32>, vector<128x128xf32>, vector<8x128xf32> -> vector<8x128xf32>
    %c0_9 = arith.constant 0 : index
    %c0_10 = arith.constant 0 : index
    %13 = vector.load %arg5[%c0_9, %c0_10] : memref<1x128xf32, #tpu.memory_space<vmem>>, vector<1x128xf32>
    %14 = vector.broadcast %13 : vector<1x128xf32> to vector<8x128xf32>
    %15 = arith.addf %12, %14 : vector<8x128xf32>
    %c0_11 = arith.constant 0 : index
    %c0_12 = arith.constant 0 : index
    %16 = vector.load %arg6[%c0_11, %c0_12] : memref<8x128xf32, #tpu.memory_space<vmem>>, vector<8x128xf32>
    tpu.vector_store %arg6[%c0_11, %c0_12], %15 {strides = array<i32>} : memref<8x128xf32, #tpu.memory_space<vmem>>, vector<8x128xf32>,
    return
  }
  func.func @transform_0(%arg0: i32) -> (i32, i32) {
    %c0_i32 = arith.constant 0 : i32
    %c0_i32_0 = arith.constant 0 : i32
    return %arg0, %c0_i32 : i32, i32
  }
  func.func @transform_1(%arg0: i32) -> (i32, i32) {
    %c0_i32 = arith.constant 0 : i32
    %c0_i32_0 = arith.constant 0 : i32
    %c0_i32_1 = arith.constant 0 : i32
    return %c0_i32, %c0_i32_0 : i32, i32
  }
  func.func @transform_2(%arg0: i32) -> (i32, i32) {
    %c0_i32 = arith.constant 0 : i32
    %c0_i32_0 = arith.constant 0 : i32
    %c0_i32_1 = arith.constant 0 : i32
    return %c0_i32, %c0_i32_0 : i32, i32
  }
  func.func @transform_3(%arg0: i32) -> (i32, i32) {
    %c0_i32 = arith.constant 0 : i32
    %c0_i32_0 = arith.constant 0 : i32
    %c0_i32_1 = arith.constant 0 : i32
    return %c0_i32, %c0_i32_0 : i32, i32
  }
  func.func @transform_4(%arg0: i32) -> (i32, i32) {
    %c0_i32 = arith.constant 0 : i32
    %c0_i32_0 = arith.constant 0 : i32
    %c0_i32_1 = arith.constant 0 : i32
    return %c0_i32, %c0_i32_0 : i32, i32
  }
  func.func @transform_5(%arg0: i32) -> (i32, i32) {
    %c0_i32 = arith.constant 0 : i32
    %c0_i32_0 = arith.constant 0 : i32
    return %arg0, %c0_i32 : i32, i32
  }
}

</mosaic_0001>

<bundles_post_ra>
// kernel: tpu_custom_call.1
= control target key start
LH: loop header
LB: loop body
LE: loop exit
PB: predicated region body
PF: predicated region fallthrough
CT: control target
= control target key end

     0   :  { %10 = vsyncpa [#allocation3], 0  ;;  %s647_s0 = inlined_call_operand.hbm [shape: f32[8,128], index: 0, kind: input, shape index: {}]   ;;  %s648_s1 = inlined_call_operand.hbm [shape: f32[128,128], index: 1, kind: input, shape index: {}]   ;;  %s649_s2 = inlined_call_operand.vmem [shape: f32[1,128], index: 2, kind: input, shape index: {}]   ;;  %s650_s3 = inlined_call_operand.hbm [shape: f32[128,128], index: 3, kind: input, shape index: {}]   ;;  %s651_s4 = inlined_call_operand.vmem [shape: f32[1,128], index: 4, kind: input, shape index: {}]   ;;  %s652_s5 = inlined_call_operand.hbm [shape: f32[8,128], index: 5, kind: output, shape index: {}]  }
   0x1   :  { %11 = vsyncpa [#allocation6], 0 }
   0x2   :  { %12 = vsyncpa [#allocation4], 0  ;;  %s532_s18 = smov [#allocation5]   ;;  %s438_s22 = scalar_lea.hbm %s648_s1, 2048 }
   0x3   :  { %s28_s19 = sshll.u32 %s532_s18, 4  ;;  %p439_p0 = scmp.ne.s32.totalorder %s648_s1, %s438_s22  ;;  %s29_s19 = int_to_ptr.vmem [resolvable:$true] %s28_s19 }
   0x4   :  { %p442_p1 = scmp.lt.u32.totalorder %s438_s22, %s648_s1 }
   0x6   :  { %p444_p2 = pnand %p442_p1, %p439_p0 }
   0x8   :  { %447 = shalt.err (!%p444_p2)
}
   0x9   :  { %s448_s27 = scalar_lea.vmem %s29_s19, 2048  ;;  %p453_p4 = scmp.lt.s32.totalorder %s29_s19, %s29_s19 }
   0xa   :  { %p449_p3 = scmp.ne.s32.totalorder %s29_s19, %s448_s27  ;;  %p454_p5 = scmp.lt.s32.totalorder %s448_s27, %s448_s27 }
   0xc   :  { %p455_p6 = por %p454_p5, %p453_p4 }
   0xe   :  { %p456_p7 = pnand %p455_p6, %p449_p3 }
  0x10   :  { %459 = shalt.err (!%p456_p7)
}
  0x11   :  { %s533_s28 = smov 128   ;;  %s534_s29 = smov 8  }
  0x12   :  { %34 = dma.hbm_to_vmem [thread:$0]  %s648_s1, 2048, %s29_s19, [#allocation6], %s533_s28, %s533_s28, %s534_s29  }
  0x13   :  { %s535_s7 = smov [#allocation2]   ;;  %s536_s9 = smov [#allocation7]  }
  0x14   :  { %s19_s8 = sshll.u32 %s535_s7, 4  ;;  %s42_s10 = sshll.u32 %s536_s9, 4  ;;  %s20_s8 = int_to_ptr.vmem [resolvable:$true] %s19_s8  ;;  %s43_s10 = int_to_ptr.vmem [resolvable:$true] %s42_s10 }
  0x15   :  { %s460_s13 = scalar_lea.hbm %s647_s0, 128 }
  0x16   :  { %p461_p8 = scmp.ne.s32.totalorder %s647_s0, %s460_s13  ;;  %p464_p9 = scmp.lt.u32.totalorder %s460_s13, %s647_s0 }
  0x18   :  { %p466_p10 = pnand %p464_p9, %p461_p8 }
  0x1a   :  { %469 = shalt.err (!%p466_p10)
}
  0x1b   :  { %s470_s1 = scalar_lea.vmem %s20_s8, 128  ;;  %p475_p12 = scmp.lt.s32.totalorder %s20_s8, %s20_s8 }
  0x1c   :  { %p471_p11 = scmp.ne.s32.totalorder %s20_s8, %s470_s1  ;;  %p476_p13 = scmp.lt.s32.totalorder %s470_s1, %s470_s1 }
  0x1e   :  { %p477_p0 = por %p476_p13, %p475_p12 }
  0x20   :  { %p478_p1 = pnand %p477_p0, %p471_p11 }
  0x22   :  { %481 = shalt.err (!%p478_p1)
}
  0x23   :  { %22 = dma.hbm_to_vmem [thread:$0]  %s647_s0, 128, %s20_s8, [#allocation3]  }
  0x24   :  { %s482_s22 = scalar_lea.hbm %s650_s3, 2048 }
  0x25   :  { %p483_p2 = scmp.ne.s32.totalorder %s650_s3, %s482_s22  ;;  %p486_p3 = scmp.lt.u32.totalorder %s482_s22, %s650_s3 }
  0x27   :  { %p488_p4 = pnand %p486_p3, %p483_p2 }
  0x29   :  { %491 = shalt.err (!%p488_p4)
}
  0x2a   :  { %s492_s27 = scalar_lea.vmem %s43_s10, 2048  ;;  %p497_p6 = scmp.lt.s32.totalorder %s43_s10, %s43_s10 }
  0x2b   :  { %p493_p5 = scmp.ne.s32.totalorder %s43_s10, %s492_s27  ;;  %p498_p7 = scmp.lt.s32.totalorder %s492_s27, %s492_s27 }
  0x2d   :  { %p499_p8 = por %p498_p7, %p497_p6 }
  0x2f   :  { %p500_p9 = pnand %p499_p8, %p493_p5 }
  0x31   :  { %503 = shalt.err (!%p500_p9)
}
  0x32   :  { %48 = dma.hbm_to_vmem [thread:$0]  %s650_s3, 2048, %s43_s10, [#allocation6], %s533_s28, %s533_s28, %s534_s29  }
  0x33   :  { %526 = dma.done.wait [#allocation3], 128  }
  0x34   :  { %527 = vsyncadd [#allocation3], 4294967168 }
  0x35   :  { %528 = dma.done.wait [#allocation6], 4096  }
  0x36   :  { %529 = vsyncadd [#allocation6], 4294963200  ;;  %v537_v0 = vmov 0.0|0.0   ;;  %vm538_vm0 = vmmov 0   ;;  %v539_v1 = vmov 0.0   ;;  %v61_v2 = vld [vmem:[#allocation5] sm:$0xff] }
  0x37   :  { %377 = vmatprep.subr.bf16.mxu0 %v537_v0  ;;  %339 = vmatprep.mubr.msk.f32.mxu0 %vm538_vm0, %v539_v1  ;;  %v62_v3 = vld [vmem:[#allocation5 + $0x8] sm:$0xff]  ;;  %v63_v4 = vld [vmem:[#allocation5 + $0x10] sm:$0xff]  ;;  %v64_v6 = vld [vmem:[#allocation5 + $0x18] sm:$0xff]  ;;  %s540_s7 = smov [#allocation8]  }
  0x38   :  { %401 = vmatprep.subr.bf16.mxu1 %v537_v0  ;;  %374 = vmatprep.mubr.msk.f32.mxu1 %vm538_vm0, %v539_v1  ;;  %v378_v5 = vpack.c.bf16 %v62_v3, %v61_v2  ;;  %v381_v7 = vpack.c.bf16 %v64_v6, %v63_v4  ;;  %v65_v8 = vld [vmem:[#allocation5 + $0x20] sm:$0xff]  ;;  %v66_v9 = vld [vmem:[#allocation5 + $0x28] sm:$0xff]  ;;  %v67_v14 = vld [vmem:[#allocation5 + $0x30] sm:$0xff]  ;;  %s260_s8 = sshll.u32 %s540_s7, 4  ;;  %s261_s8 = int_to_ptr.vmem [resolvable:$true] %s260_s8 }
  0x39   :  { %v160_v10 = vld [vmem:[#allocation7] sm:$0xff]  ;;  %v161_v11 = vld [vmem:[#allocation7 + $0x8] sm:$0xff]  ;;  %v384_v12 = vpack.c.bf16 %v66_v9, %v65_v8  ;;  %v68_v15 = vld [vmem:[#allocation5 + $0x38] sm:$0xff]  ;;  %p509_p11 = scmp.lt.s32.totalorder %s261_s8, %s261_s8 }
  0x3a   :  { %379 = vmatpush3.bf16.msra.mxu0 %v378_v5  ;;  %v402_v13 = vpack.c.bf16 %v161_v11, %v160_v10  ;;  %v387_v16 = vpack.c.bf16 %v68_v15, %v67_v14  ;;  %v69_v17 = vld [vmem:[#allocation5 + $0x40] sm:$0xff]  ;;  %v70_v18 = vld [vmem:[#allocation5 + $0x48] sm:$0xff]  ;;  %v71_v20 = vld [vmem:[#allocation5 + $0x50] sm:$0xff] }
  0x3b   :  { %380 = vmatprep.subr.bf16.mxu0 %v537_v0  ;;  %v390_v19 = vpack.c.bf16 %v70_v18, %v69_v17  ;;  %v72_v21 = vld [vmem:[#allocation5 + $0x58] sm:$0xff]  ;;  %v73_v23 = vld [vmem:[#allocation5 + $0x60] sm:$0xff]  ;;  %v74_v24 = vld [vmem:[#allocation5 + $0x68] sm:$0xff] }
  0x3c   :  { %403 = vmatpush3.bf16.msra.mxu1 %v402_v13  ;;  %v393_v22 = vpack.c.bf16 %v72_v21, %v71_v20  ;;  %v396_v25 = vpack.c.bf16 %v74_v24, %v73_v23  ;;  %v75_v26 = vld [vmem:[#allocation5 + $0x70] sm:$0xff]  ;;  %v76_v27 = vld [vmem:[#allocation5 + $0x78] sm:$0xff]  ;;  %v164_v33 = vld [vmem:[#allocation7 + $0x20] sm:$0xff] }
  0x3d   :  { %404 = vmatprep.subr.bf16.mxu1 %v537_v0  ;;  %v399_v28 = vpack.c.bf16 %v76_v27, %v75_v26  ;;  %v60_v29 = vld [vmem:[#allocation2] sm:$0xff]  ;;  %v162_v30 = vld [vmem:[#allocation7 + $0x10] sm:$0xff]  ;;  %v165_v34 = vld [vmem:[#allocation7 + $0x28] sm:$0xff] }
  0x3e   :  { %382 = vmatpush3.bf16.msra.mxu0 %v381_v7  ;;  %v163_v31 = vld [vmem:[#allocation7 + $0x18] sm:$0xff]  ;;  %v408_v35 = vpack.c.bf16 %v165_v34, %v164_v33  ;;  %v166_v36 = vld [vmem:[#allocation7 + $0x30] sm:$0xff]  ;;  %v168_v39 = vld [vmem:[#allocation7 + $0x40] sm:$0xff] }
  0x3f   :  { %383 = vmatprep.subr.bf16.mxu0 %v537_v0  ;;  %v405_v32 = vpack.c.bf16 %v163_v31, %v162_v30  ;;  %v167_v37 = vld [vmem:[#allocation7 + $0x38] sm:$0xff]  ;;  %v169_v40 = vld [vmem:[#allocation7 + $0x48] sm:$0xff]  ;;  %v170_v42 = vld [vmem:[#allocation7 + $0x50] sm:$0xff] }
  0x40   :  { %v411_v38 = vpack.c.bf16 %v167_v37, %v166_v36  ;;  %v414_v41 = vpack.c.bf16 %v169_v40, %v168_v39  ;;  %v171_v43 = vld [vmem:[#allocation7 + $0x58] sm:$0xff]  ;;  %v172_v45 = vld [vmem:[#allocation7 + $0x60] sm:$0xff]  ;;  %v173_v46 = vld [vmem:[#allocation7 + $0x68] sm:$0xff] }
  0x41   :  { %406 = vmatpush3.bf16.msra.mxu1 %v405_v32  ;;  %v417_v44 = vpack.c.bf16 %v171_v43, %v170_v42  ;;  %v420_v47 = vpack.c.bf16 %v173_v46, %v172_v45  ;;  %v174_v48 = vld [vmem:[#allocation7 + $0x70] sm:$0xff]  ;;  %v175_v49 = vld [vmem:[#allocation7 + $0x78] sm:$0xff] }
  0x42   :  { %385 = vmatpush3.bf16.msra.mxu0 %v384_v12  ;;  %407 = vmatprep.subr.bf16.mxu1 %v537_v0  ;;  %v423_v50 = vpack.c.bf16 %v175_v49, %v174_v48  ;;  %v270_v51 = vld [vmem:[%s649_s2] ss:$0 sm:$0xff]  ;;  %s504_s2 = scalar_lea.vmem %s261_s8, 128 }
  0x43   :  { %386 = vmatprep.subr.bf16.mxu0 %v537_v0  ;;  %v272_v59 = vld [vmem:[%s651_s4] ss:$0 sm:$0xff]  ;;  %p505_p10 = scmp.ne.s32.totalorder %s261_s8, %s504_s2  ;;  %p510_p12 = scmp.lt.s32.totalorder %s504_s2, %s504_s2 }
  0x45   :  { %409 = vmatpush3.bf16.msra.mxu1 %v408_v35  ;;  %p511_p13 = por %p510_p12, %p509_p11 }
  0x46   :  { %388 = vmatpush3.bf16.msra.mxu0 %v387_v16  ;;  %410 = vmatprep.subr.bf16.mxu1 %v537_v0 }
  0x47   :  { %389 = vmatprep.subr.bf16.mxu0 %v537_v0  ;;  %p512_p0 = pnand %p511_p13, %p505_p10 }
  0x49   :  { %412 = vmatpush3.bf16.msra.mxu1 %v411_v38 }
  0x4a   :  { %391 = vmatpush3.bf16.msra.mxu0 %v390_v19  ;;  %413 = vmatprep.subr.bf16.mxu1 %v537_v0 }
  0x4b   :  { %392 = vmatprep.subr.bf16.mxu0 %v537_v0 }
  0x4d   :  { %415 = vmatpush3.bf16.msra.mxu1 %v414_v41 }
  0x4e   :  { %394 = vmatpush3.bf16.msra.mxu0 %v393_v22  ;;  %416 = vmatprep.subr.bf16.mxu1 %v537_v0 }
  0x4f   :  { %395 = vmatprep.subr.bf16.mxu0 %v537_v0 }
  0x51   :  { %418 = vmatpush3.bf16.msra.mxu1 %v417_v44 }
  0x52   :  { %397 = vmatpush3.bf16.msra.mxu0 %v396_v25  ;;  %419 = vmatprep.subr.bf16.mxu1 %v537_v0 }
  0x53   :  { %398 = vmatprep.subr.bf16.mxu0 %v537_v0 }
  0x55   :  { %421 = vmatpush3.bf16.msra.mxu1 %v420_v47 }
  0x56   :  { %400 = vmatpush3.bf16.msra.mxu0 %v399_v28  ;;  %422 = vmatprep.subr.bf16.mxu1 %v537_v0 }
  0x59   :  { %340 = vmatmul.mubr.f32.vlgmr.msra.gmra.mrb[0].mxu0 %v60_v29  ;;  %424 = vmatpush3.bf16.msra.mxu1 %v423_v50 }
 0x12c   :  { %v150_v52 = vpop.f32.mrb[0].mxu0 }
 0x12d   :  { %v151_v53 = vadd.f32 %v270_v51, %v150_v52  ;;  %v341_v54 = vpop.f32.mrb[1].mxu0 }
 0x12f   :  { %v271_v55 = vmul.f32 -1.442695, %v151_v53 }
 0x131   :  { %434 = vpow2.f32 %v271_v55 }
 0x13b   :  { %v435_v56 = vpop.eup %434 }
 0x13c   :  { %v157_v57 = vadd.f32 1.0, %v435_v56 }
 0x13e   :  { %436 = vrcp.f32 %v157_v57 }
 0x148   :  { %v437_v58 = vpop.eup %436 }
 0x149   :  { %375 = vmatmul.mubr.f32.vlgmr.msra.gmra.mrb[0].mxu1 %v437_v58 }
 0x21c   :  { %v249_v60 = vpop.f32.mrb[0].mxu1 }
 0x21d   :  { %v250_v61 = vadd.f32 %v272_v59, %v249_v60  ;;  %v376_v62 = vpop.f32.mrb[1].mxu1 }
 0x21f   :  { %253 = vst [vmem:[#allocation8] sm:$0xff] %v250_v61 }
 0x220   :  { %515 = shalt.err (!%p512_p0)
}
 0x221   :  { %s516_s11 = scalar_lea.hbm %s652_s5, 128 }
 0x222   :  { %p517_p1 = scmp.ne.s32.totalorder %s652_s5, %s516_s11  ;;  %p520_p2 = scmp.lt.u32.totalorder %s516_s11, %s652_s5 }
 0x224   :  { %p522_p3 = pnand %p520_p2, %p517_p1 }
 0x226   :  { %525 = shalt.err (!%p522_p3)
}
 0x227   :  { %263 = dma.vmem_to_hbm [thread:$0]  %s261_s8, 128, %s652_s5, [#allocation4]  }
 0x228   :  { %530 = dma.done.wait [#allocation4], 128  }
 0x229   :  { %531 = vsyncadd [#allocation4], 4294967168 }
 0x22a   :  { %267 = vsyncpa [#allocation3], 1 }
 0x22b   :  { %268 = vsyncpa [#allocation6], 1 }
 0x22c   :  { %269 = vsyncpa [#allocation4], 1 }

</bundles_post_ra>
